<compile_context>
chip_gen: v6e
topology: v6e:2x2x1
jax: 0.10.0
libtpu: 0.0.40
codegen_flags: <defaults>
</compile_context>

<pallas_src>
import functools

import jax
import jax.numpy as jnp
from jax import lax
from jax.experimental import pallas as pl
from jax.experimental.pallas import tpu as pltpu

PAD_IDX = 0  # stand-in for constants.PAD_IDX in the original module


def _charcnn_kernel(ids_ref, wf_ref, b_ref, out_ref, *,
                    TB, L, n_tok, feature_maps, kernel_sizes, col_offsets):
    """One batch-block of the CharCNN forward.

    ids_ref : (TB, L)              int32 token ids
    wf_ref  : (n_tok, total_cols)  bf16 fused (embedding @ conv-rows) weights;
                                   columns grouped by conv i, then kernel row j
    b_ref   : (1, total_fm)        f32 concatenated conv biases
    out_ref : (TB, total_fm)       f32 pooled features
    """
    n_conv = len(feature_maps)
    R = L * TB

    # ---- One-hot over tokens, laid out time-major -----------------------------
    # Rows [l*TB : (l+1)*TB] of the one-hot correspond to character position l.
    ids = ids_ref[...]                                              # (TB, L) int32
    ids_col = jnp.concatenate([ids[:, l:l + 1] for l in range(L)], axis=0)  # (R, 1)
    tok_iota = lax.broadcasted_iota(jnp.int32, (R, n_tok), 1)
    onehot = (ids_col == tok_iota).astype(jnp.bfloat16)             # exact in bf16

    # ---- Single fused MXU pass -------------------------------------------------
    # Embedding lookup folded into every conv kernel row; lane-dense N=total_cols,
    # bf16 operands, f32 accumulation.
    proj = jnp.dot(onehot, wf_ref[...],
                   preferred_element_type=jnp.float32)              # (R, total_cols)

    # Per-time slabs (aligned sublane slices whenever TB % 8 == 0).
    slabs = [proj[l * TB:(l + 1) * TB, :] for l in range(L)]        # each (TB, C)

    # ---- Conv shift-accumulate + max-over-time (pool BEFORE bias/tanh) --------
    pooled = []
    for i in range(n_conv):
        fm, ks, c0 = feature_maps[i], kernel_sizes[i], col_offsets[i]
        best = None
        for t in range(L - ks + 1):
            v = slabs[t][:, c0:c0 + fm]
            for j in range(1, ks):
                v = v + slabs[t + j][:, c0 + j * fm:c0 + (j + 1) * fm]
            best = v if best is None else jnp.maximum(best, v)      # (TB, fm)
        pooled.append(best)

    # Bias-add and tanh AFTER pooling (tanh monotonic, bias time-invariant):
    # one EUP pass over (TB, total_fm) and a single lane-dense store.
    feats = jnp.concatenate(pooled, axis=-1) + b_ref[...]           # (TB, total_fm)
    out_ref[...] = jnp.tanh(feats).astype(out_ref.dtype)


def charcnn_forward(x, emb_table, conv_weights, conv_biases, *, batch_block=256):
    """Pallas equivalent of CharCNN.forward.

    x:            (B, ch_maxlen) integer token ids
    emb_table:    (n_ch_tokens, ch_emb_size) f32 (row PAD_IDX already zeroed)
    conv_weights: list of (fm_i, 1, ks_i, ch_emb_size) f32 (PyTorch Conv2d layout)
    conv_biases:  list of (fm_i,) f32
    returns:      (B, sum(fm_i)) f32
    """
    B, L = x.shape
    n_tok, E = emb_table.shape
    feature_maps = tuple(int(w.shape[0]) for w in conv_weights)
    kernel_sizes = tuple(int(w.shape[2]) for w in conv_weights)
    assert len(feature_maps) == len(kernel_sizes)
    assert all(ks <= L for ks in kernel_sizes), "kernel size must be <= ch_maxlen"
    total_fm = int(sum(feature_maps))

    # Fused weight column layout: grouped by conv i, within a conv by kernel row j.
    col_offsets, off = [], 0
    for fm, ks in zip(feature_maps, kernel_sizes):
        col_offsets.append(off)
        off += ks * fm
    total_cols = off

    # W_all (E, total_cols): column block for (conv i, row j) holds w_i[:, j, :]^T.
    blocks = []
    for i, (fm, ks) in enumerate(zip(feature_maps, kernel_sizes)):
        w = jnp.asarray(conv_weights[i], jnp.float32).reshape(fm, ks, E)
        blocks.append(jnp.transpose(w, (2, 1, 0)).reshape(E, ks * fm))
    w_all = jnp.concatenate(blocks, axis=1)                          # (E, total_cols)

    # Fold the embedding into the conv projection; cast to bf16 (MXU-native),
    # keep f32 accumulation inside the kernel.
    w_fused = jnp.dot(jnp.asarray(emb_table, jnp.float32), w_all,
                      precision=jax.lax.Precision.HIGHEST)
    w_fused = w_fused.astype(jnp.bfloat16)                           # (n_tok, C)
    b_all = jnp.concatenate(
        [jnp.asarray(b, jnp.float32).reshape(1, -1) for b in conv_biases],
        axis=1)                                                      # (1, total_fm)

    # Batch tiling: tiny batches -> one exact block (no padding); moderate
    # batches -> at least 2 blocks (multiple of 8 rows) so v7x's two TensorCores
    # both get work; large batches -> `batch_block`-row blocks.
    if B <= 8:
        TB = B
    else:
        half = -(-B // 2)
        TB = min(batch_block, ((half + 7) // 8) * 8)
    n_blocks = -(-B // TB)
    B_pad = n_blocks * TB

    ids = jnp.asarray(x, jnp.int32)
    if B_pad != B:
        ids = jnp.pad(ids, ((0, B_pad - B), (0, 0)), constant_values=PAD_IDX)

    kernel = functools.partial(
        _charcnn_kernel, TB=TB, L=L, n_tok=n_tok,
        feature_maps=feature_maps, kernel_sizes=kernel_sizes,
        col_offsets=tuple(col_offsets))

    out = pl.pallas_call(
        kernel,
        out_shape=jax.ShapeDtypeStruct((B_pad, total_fm), jnp.float32),
        grid_spec=pltpu.PrefetchScalarGridSpec(
            num_scalar_prefetch=0,
            grid=(n_blocks,),
            in_specs=[
                pl.BlockSpec((TB, L), lambda i: (i, 0)),             # token ids
                pl.BlockSpec((n_tok, total_cols), lambda i: (0, 0)),  # fused weights
                pl.BlockSpec((1, total_fm), lambda i: (0, 0)),        # biases
            ],
            out_specs=pl.BlockSpec((TB, total_fm), lambda i: (i, 0)),
        ),
        compiler_params=pltpu.CompilerParams(
            dimension_semantics=("parallel",),
            vmem_limit_bytes=32 * 1024 * 1024),
    )(ids, w_fused, b_all)

    return out[:B] if B_pad != B else out


def charcnn_reference(x, emb_table, conv_weights, conv_biases):
    """Pure-JAX reference matching CharCNN.forward semantics (f32 throughout)."""
    B, L = x.shape
    x_embs = emb_table[x]                                    # (B, L, E)
    feats = []
    for w, bias in zip(conv_weights, conv_biases):
        fm, _, ks, E = w.shape
        red = L - ks + 1
        w2 = w.reshape(fm, ks * E)
        cols = []
        for t in range(red):
            win = x_embs[:, t:t + ks, :].reshape(B, ks * E)
            cols.append(jnp.dot(win, w2.T,
                                precision=jax.lax.Precision.HIGHEST) + bias)
        conv = jnp.stack(cols, axis=1)                       # (B, red, fm)
        feats.append(jnp.max(jnp.tanh(conv), axis=1))        # (B, fm)
    return jnp.concatenate(feats, axis=1)


if __name__ == "__main__":
    key = jax.random.PRNGKey(0)

    # Small CharCNN config.
    n_ch_tokens = 64
    ch_maxlen = 16
    ch_emb_size = 32
    ch_feature_maps = [32, 32, 64]
    ch_kernel_sizes = [2, 3, 4]
    batch = 2

    k_ids, k_emb, *k_params = jax.random.split(key, 2 + 2 * len(ch_feature_maps))

    # Token ids.
    x = jax.random.randint(k_ids, (batch, ch_maxlen), 0, n_ch_tokens,
                           dtype=jnp.int32)

    # Embedding table (padding row zeroed, mirroring nn.Embedding(padding_idx=PAD_IDX)).
    initrange = 0.5 / ch_emb_size
    emb_table = jax.random.uniform(k_emb, (n_ch_tokens, ch_emb_size),
                                   minval=-initrange, maxval=initrange,
                                   dtype=jnp.float32)
    emb_table = emb_table.at[PAD_IDX].set(0.0)

    # Conv weights in PyTorch layout (out_ch, in_ch=1, ks, emb); xavier-like scale.
    # Biases nonzero to exercise the bias path (init_ch would zero them).
    conv_weights, conv_biases = [], []
    for i, (fm, ks) in enumerate(zip(ch_feature_maps, ch_kernel_sizes)):
        limit = (6.0 / (ks * ch_emb_size + fm)) ** 0.5
        w = jax.random.uniform(k_params[2 * i], (fm, 1, ks, ch_emb_size),
                               minval=-limit, maxval=limit, dtype=jnp.float32)
        b = jax.random.uniform(k_params[2 * i + 1], (fm,),
                               minval=-0.1, maxval=0.1, dtype=jnp.float32)
        conv_weights.append(w)
        conv_biases.append(b)

    y = charcnn_forward(x, emb_table, conv_weights, conv_biases)
    y = jax.block_until_ready(y)

    y_ref = charcnn_reference(x, emb_table, conv_weights, conv_biases)
    y_ref = jax.block_until_ready(y_ref)

    assert y.shape == (batch, sum(ch_feature_maps)), y.shape
    assert y.dtype == jnp.float32, y.dtype
    max_err = float(jnp.max(jnp.abs(y - y_ref)))
    assert bool(jnp.allclose(y, y_ref, rtol=2e-3, atol=2e-3)), max_err

    print("KERNEL_OK")
</pallas_src>

<mosaic_0001>
module attributes {stable_mosaic.version = 11 : i64} {
  func.func @_charcnn_kernel(%arg0: i32, %arg1: memref<2x16xi32, #tpu.memory_space<vmem>>, %arg2: memref<64x416xbf16, #tpu.memory_space<vmem>>, %arg3: memref<1x128xf32, #tpu.memory_space<vmem>>, %arg4: memref<2x128xf32, #tpu.memory_space<vmem>>) attributes {dimension_semantics = [#tpu.dimension_semantics<parallel>], iteration_bounds = array<i64: 1>, scalar_prefetch = 0 : i64, scratch_operands = 0 : i64, tpu.core_type = #tpu.core_type<tc>, window_params = [{transform_indices = @transform_0, window_bounds = array<i64: 2, 16>}, {pipeline_mode = #tpu.pipeline_mode<synchronous>, transform_indices = @transform_1, window_bounds = array<i64: 64, 416>}, {pipeline_mode = #tpu.pipeline_mode<synchronous>, transform_indices = @transform_2, window_bounds = array<i64: 1, 128>}, {transform_indices = @transform_3, window_bounds = array<i64: 2, 128>}]} {
    %c0 = arith.constant 0 : index
    %c0_0 = arith.constant 0 : index
    %0 = vector.load %arg1[%c0, %c0_0] : memref<2x16xi32, #tpu.memory_space<vmem>>, vector<2x16xi32>
    %1 = vector.extract_strided_slice %0 {offsets = [0, 0], sizes = [2, 1], strides = [1, 1]} : vector<2x16xi32> to vector<2x1xi32>
    %2 = vector.extract_strided_slice %0 {offsets = [0, 1], sizes = [2, 1], strides = [1, 1]} : vector<2x16xi32> to vector<2x1xi32>
    %3 = vector.extract_strided_slice %0 {offsets = [0, 2], sizes = [2, 1], strides = [1, 1]} : vector<2x16xi32> to vector<2x1xi32>
    %4 = vector.extract_strided_slice %0 {offsets = [0, 3], sizes = [2, 1], strides = [1, 1]} : vector<2x16xi32> to vector<2x1xi32>
    %5 = vector.extract_strided_slice %0 {offsets = [0, 4], sizes = [2, 1], strides = [1, 1]} : vector<2x16xi32> to vector<2x1xi32>
    %6 = vector.extract_strided_slice %0 {offsets = [0, 5], sizes = [2, 1], strides = [1, 1]} : vector<2x16xi32> to vector<2x1xi32>
    %7 = vector.extract_strided_slice %0 {offsets = [0, 6], sizes = [2, 1], strides = [1, 1]} : vector<2x16xi32> to vector<2x1xi32>
    %8 = vector.extract_strided_slice %0 {offsets = [0, 7], sizes = [2, 1], strides = [1, 1]} : vector<2x16xi32> to vector<2x1xi32>
    %9 = vector.extract_strided_slice %0 {offsets = [0, 8], sizes = [2, 1], strides = [1, 1]} : vector<2x16xi32> to vector<2x1xi32>
    %10 = vector.extract_strided_slice %0 {offsets = [0, 9], sizes = [2, 1], strides = [1, 1]} : vector<2x16xi32> to vector<2x1xi32>
    %11 = vector.extract_strided_slice %0 {offsets = [0, 10], sizes = [2, 1], strides = [1, 1]} : vector<2x16xi32> to vector<2x1xi32>
    %12 = vector.extract_strided_slice %0 {offsets = [0, 11], sizes = [2, 1], strides = [1, 1]} : vector<2x16xi32> to vector<2x1xi32>
    %13 = vector.extract_strided_slice %0 {offsets = [0, 12], sizes = [2, 1], strides = [1, 1]} : vector<2x16xi32> to vector<2x1xi32>
    %14 = vector.extract_strided_slice %0 {offsets = [0, 13], sizes = [2, 1], strides = [1, 1]} : vector<2x16xi32> to vector<2x1xi32>
    %15 = vector.extract_strided_slice %0 {offsets = [0, 14], sizes = [2, 1], strides = [1, 1]} : vector<2x16xi32> to vector<2x1xi32>
    %16 = vector.extract_strided_slice %0 {offsets = [0, 15], sizes = [2, 1], strides = [1, 1]} : vector<2x16xi32> to vector<2x1xi32>
    %17 = tpu.concatenate %1, %2, %3, %4, %5, %6, %7, %8, %9, %10, %11, %12, %13, %14, %15, %16 in 0 : vector<2x1xi32>, vector<2x1xi32>, vector<2x1xi32>, vector<2x1xi32>, vector<2x1xi32>, vector<2x1xi32>, vector<2x1xi32>, vector<2x1xi32>, vector<2x1xi32>, vector<2x1xi32>, vector<2x1xi32>, vector<2x1xi32>, vector<2x1xi32>, vector<2x1xi32>, vector<2x1xi32>, vector<2x1xi32> -> vector<32x1xi32>
    %18 = tpu.iota {dimensions = array<i32: 1>} : vector<32x64xi32>
    %19 = vector.broadcast %17 : vector<32x1xi32> to vector<32x64xi32>
    %20 = arith.cmpi eq, %19, %18 : vector<32x64xi32>
    %21 = arith.extui %20 : vector<32x64xi1> to vector<32x64xi32>
    %22 = arith.sitofp %21 : vector<32x64xi32> to vector<32x64xf32>
    %23 = arith.truncf %22 : vector<32x64xf32> to vector<32x64xbf16>
    %c0_1 = arith.constant 0 : index
    %c0_2 = arith.constant 0 : index
    %24 = vector.load %arg2[%c0_1, %c0_2] : memref<64x416xbf16, #tpu.memory_space<vmem>>, vector<64x416xbf16>
    %cst = arith.constant dense<0.000000e+00> : vector<32x416xf32>
    %25 = tpu.matmul %23, %24, %cst {dimension_numbers = #tpu.dot_dimension_numbers<[1], [0], [0], [1], [0, 0, 1, 1], [], []>} : vector<32x64xbf16>, vector<64x416xbf16>, vector<32x416xf32> -> vector<32x416xf32>
    %26 = vector.extract_strided_slice %25 {offsets = [0, 0], sizes = [2, 416], strides = [1, 1]} : vector<32x416xf32> to vector<2x416xf32>
    %27 = vector.extract_strided_slice %25 {offsets = [2, 0], sizes = [2, 416], strides = [1, 1]} : vector<32x416xf32> to vector<2x416xf32>
    %28 = vector.extract_strided_slice %25 {offsets = [4, 0], sizes = [2, 416], strides = [1, 1]} : vector<32x416xf32> to vector<2x416xf32>
    %29 = vector.extract_strided_slice %25 {offsets = [6, 0], sizes = [2, 416], strides = [1, 1]} : vector<32x416xf32> to vector<2x416xf32>
    %30 = vector.extract_strided_slice %25 {offsets = [8, 0], sizes = [2, 416], strides = [1, 1]} : vector<32x416xf32> to vector<2x416xf32>
    %31 = vector.extract_strided_slice %25 {offsets = [10, 0], sizes = [2, 416], strides = [1, 1]} : vector<32x416xf32> to vector<2x416xf32>
    %32 = vector.extract_strided_slice %25 {offsets = [12, 0], sizes = [2, 416], strides = [1, 1]} : vector<32x416xf32> to vector<2x416xf32>
    %33 = vector.extract_strided_slice %25 {offsets = [14, 0], sizes = [2, 416], strides = [1, 1]} : vector<32x416xf32> to vector<2x416xf32>
    %34 = vector.extract_strided_slice %25 {offsets = [16, 0], sizes = [2, 416], strides = [1, 1]} : vector<32x416xf32> to vector<2x416xf32>
    %35 = vector.extract_strided_slice %25 {offsets = [18, 0], sizes = [2, 416], strides = [1, 1]} : vector<32x416xf32> to vector<2x416xf32>
    %36 = vector.extract_strided_slice %25 {offsets = [20, 0], sizes = [2, 416], strides = [1, 1]} : vector<32x416xf32> to vector<2x416xf32>
    %37 = vector.extract_strided_slice %25 {offsets = [22, 0], sizes = [2, 416], strides = [1, 1]} : vector<32x416xf32> to vector<2x416xf32>
    %38 = vector.extract_strided_slice %25 {offsets = [24, 0], sizes = [2, 416], strides = [1, 1]} : vector<32x416xf32> to vector<2x416xf32>
    %39 = vector.extract_strided_slice %25 {offsets = [26, 0], sizes = [2, 416], strides = [1, 1]} : vector<32x416xf32> to vector<2x416xf32>
    %40 = vector.extract_strided_slice %25 {offsets = [28, 0], sizes = [2, 416], strides = [1, 1]} : vector<32x416xf32> to vector<2x416xf32>
    %41 = vector.extract_strided_slice %25 {offsets = [30, 0], sizes = [2, 416], strides = [1, 1]} : vector<32x416xf32> to vector<2x416xf32>
    %42 = vector.extract_strided_slice %26 {offsets = [0, 0], sizes = [2, 32], strides = [1, 1]} : vector<2x416xf32> to vector<2x32xf32>
    %43 = vector.extract_strided_slice %27 {offsets = [0, 32], sizes = [2, 32], strides = [1, 1]} : vector<2x416xf32> to vector<2x32xf32>
    %44 = arith.addf %42, %43 : vector<2x32xf32>
    %45 = vector.extract_strided_slice %27 {offsets = [0, 0], sizes = [2, 32], strides = [1, 1]} : vector<2x416xf32> to vector<2x32xf32>
    %46 = vector.extract_strided_slice %28 {offsets = [0, 32], sizes = [2, 32], strides = [1, 1]} : vector<2x416xf32> to vector<2x32xf32>
    %47 = arith.addf %45, %46 : vector<2x32xf32>
    %48 = arith.maximumf %44, %47 : vector<2x32xf32>
    %49 = vector.extract_strided_slice %28 {offsets = [0, 0], sizes = [2, 32], strides = [1, 1]} : vector<2x416xf32> to vector<2x32xf32>
    %50 = vector.extract_strided_slice %29 {offsets = [0, 32], sizes = [2, 32], strides = [1, 1]} : vector<2x416xf32> to vector<2x32xf32>
    %51 = arith.addf %49, %50 : vector<2x32xf32>
    %52 = arith.maximumf %48, %51 : vector<2x32xf32>
    %53 = vector.extract_strided_slice %29 {offsets = [0, 0], sizes = [2, 32], strides = [1, 1]} : vector<2x416xf32> to vector<2x32xf32>
    %54 = vector.extract_strided_slice %30 {offsets = [0, 32], sizes = [2, 32], strides = [1, 1]} : vector<2x416xf32> to vector<2x32xf32>
    %55 = arith.addf %53, %54 : vector<2x32xf32>
    %56 = arith.maximumf %52, %55 : vector<2x32xf32>
    %57 = vector.extract_strided_slice %30 {offsets = [0, 0], sizes = [2, 32], strides = [1, 1]} : vector<2x416xf32> to vector<2x32xf32>
    %58 = vector.extract_strided_slice %31 {offsets = [0, 32], sizes = [2, 32], strides = [1, 1]} : vector<2x416xf32> to vector<2x32xf32>
    %59 = arith.addf %57, %58 : vector<2x32xf32>
    %60 = arith.maximumf %56, %59 : vector<2x32xf32>
    %61 = vector.extract_strided_slice %31 {offsets = [0, 0], sizes = [2, 32], strides = [1, 1]} : vector<2x416xf32> to vector<2x32xf32>
    %62 = vector.extract_strided_slice %32 {offsets = [0, 32], sizes = [2, 32], strides = [1, 1]} : vector<2x416xf32> to vector<2x32xf32>
    %63 = arith.addf %61, %62 : vector<2x32xf32>
    %64 = arith.maximumf %60, %63 : vector<2x32xf32>
    %65 = vector.extract_strided_slice %32 {offsets = [0, 0], sizes = [2, 32], strides = [1, 1]} : vector<2x416xf32> to vector<2x32xf32>
    %66 = vector.extract_strided_slice %33 {offsets = [0, 32], sizes = [2, 32], strides = [1, 1]} : vector<2x416xf32> to vector<2x32xf32>
    %67 = arith.addf %65, %66 : vector<2x32xf32>
    %68 = arith.maximumf %64, %67 : vector<2x32xf32>
    %69 = vector.extract_strided_slice %33 {offsets = [0, 0], sizes = [2, 32], strides = [1, 1]} : vector<2x416xf32> to vector<2x32xf32>
    %70 = vector.extract_strided_slice %34 {offsets = [0, 32], sizes = [2, 32], strides = [1, 1]} : vector<2x416xf32> to vector<2x32xf32>
    %71 = arith.addf %69, %70 : vector<2x32xf32>
    %72 = arith.maximumf %68, %71 : vector<2x32xf32>
    %73 = vector.extract_strided_slice %34 {offsets = [0, 0], sizes = [2, 32], strides = [1, 1]} : vector<2x416xf32> to vector<2x32xf32>
    %74 = vector.extract_strided_slice %35 {offsets = [0, 32], sizes = [2, 32], strides = [1, 1]} : vector<2x416xf32> to vector<2x32xf32>
    %75 = arith.addf %73, %74 : vector<2x32xf32>
    %76 = arith.maximumf %72, %75 : vector<2x32xf32>
    %77 = vector.extract_strided_slice %35 {offsets = [0, 0], sizes = [2, 32], strides = [1, 1]} : vector<2x416xf32> to vector<2x32xf32>
    %78 = vector.extract_strided_slice %36 {offsets = [0, 32], sizes = [2, 32], strides = [1, 1]} : vector<2x416xf32> to vector<2x32xf32>
    %79 = arith.addf %77, %78 : vector<2x32xf32>
    %80 = arith.maximumf %76, %79 : vector<2x32xf32>
    %81 = vector.extract_strided_slice %36 {offsets = [0, 0], sizes = [2, 32], strides = [1, 1]} : vector<2x416xf32> to vector<2x32xf32>
    %82 = vector.extract_strided_slice %37 {offsets = [0, 32], sizes = [2, 32], strides = [1, 1]} : vector<2x416xf32> to vector<2x32xf32>
    %83 = arith.addf %81, %82 : vector<2x32xf32>
    %84 = arith.maximumf %80, %83 : vector<2x32xf32>
    %85 = vector.extract_strided_slice %37 {offsets = [0, 0], sizes = [2, 32], strides = [1, 1]} : vector<2x416xf32> to vector<2x32xf32>
    %86 = vector.extract_strided_slice %38 {offsets = [0, 32], sizes = [2, 32], strides = [1, 1]} : vector<2x416xf32> to vector<2x32xf32>
    %87 = arith.addf %85, %86 : vector<2x32xf32>
    %88 = arith.maximumf %84, %87 : vector<2x32xf32>
    %89 = vector.extract_strided_slice %38 {offsets = [0, 0], sizes = [2, 32], strides = [1, 1]} : vector<2x416xf32> to vector<2x32xf32>
    %90 = vector.extract_strided_slice %39 {offsets = [0, 32], sizes = [2, 32], strides = [1, 1]} : vector<2x416xf32> to vector<2x32xf32>
    %91 = arith.addf %89, %90 : vector<2x32xf32>
    %92 = arith.maximumf %88, %91 : vector<2x32xf32>
    %93 = vector.extract_strided_slice %39 {offsets = [0, 0], sizes = [2, 32], strides = [1, 1]} : vector<2x416xf32> to vector<2x32xf32>
    %94 = vector.extract_strided_slice %40 {offsets = [0, 32], sizes = [2, 32], strides = [1, 1]} : vector<2x416xf32> to vector<2x32xf32>
    %95 = arith.addf %93, %94 : vector<2x32xf32>
    %96 = arith.maximumf %92, %95 : vector<2x32xf32>
    %97 = vector.extract_strided_slice %40 {offsets = [0, 0], sizes = [2, 32], strides = [1, 1]} : vector<2x416xf32> to vector<2x32xf32>
    %98 = vector.extract_strided_slice %41 {offsets = [0, 32], sizes = [2, 32], strides = [1, 1]} : vector<2x416xf32> to vector<2x32xf32>
    %99 = arith.addf %97, %98 : vector<2x32xf32>
    %100 = arith.maximumf %96, %99 : vector<2x32xf32>
    %101 = vector.extract_strided_slice %26 {offsets = [0, 64], sizes = [2, 32], strides = [1, 1]} : vector<2x416xf32> to vector<2x32xf32>
    %102 = vector.extract_strided_slice %27 {offsets = [0, 96], sizes = [2, 32], strides = [1, 1]} : vector<2x416xf32> to vector<2x32xf32>
    %103 = arith.addf %101, %102 : vector<2x32xf32>
    %104 = vector.extract_strided_slice %28 {offsets = [0, 128], sizes = [2, 32], strides = [1, 1]} : vector<2x416xf32> to vector<2x32xf32>
    %105 = arith.addf %103, %104 : vector<2x32xf32>
    %106 = vector.extract_strided_slice %27 {offsets = [0, 64], sizes = [2, 32], strides = [1, 1]} : vector<2x416xf32> to vector<2x32xf32>
    %107 = vector.extract_strided_slice %28 {offsets = [0, 96], sizes = [2, 32], strides = [1, 1]} : vector<2x416xf32> to vector<2x32xf32>
    %108 = arith.addf %106, %107 : vector<2x32xf32>
    %109 = vector.extract_strided_slice %29 {offsets = [0, 128], sizes = [2, 32], strides = [1, 1]} : vector<2x416xf32> to vector<2x32xf32>
    %110 = arith.addf %108, %109 : vector<2x32xf32>
    %111 = arith.maximumf %105, %110 : vector<2x32xf32>
    %112 = vector.extract_strided_slice %28 {offsets = [0, 64], sizes = [2, 32], strides = [1, 1]} : vector<2x416xf32> to vector<2x32xf32>
    %113 = vector.extract_strided_slice %29 {offsets = [0, 96], sizes = [2, 32], strides = [1, 1]} : vector<2x416xf32> to vector<2x32xf32>
    %114 = arith.addf %112, %113 : vector<2x32xf32>
    %115 = vector.extract_strided_slice %30 {offsets = [0, 128], sizes = [2, 32], strides = [1, 1]} : vector<2x416xf32> to vector<2x32xf32>
    %116 = arith.addf %114, %115 : vector<2x32xf32>
    %117 = arith.maximumf %111, %116 : vector<2x32xf32>
    %118 = vector.extract_strided_slice %29 {offsets = [0, 64], sizes = [2, 32], strides = [1, 1]} : vector<2x416xf32> to vector<2x32xf32>
    %119 = vector.extract_strided_slice %30 {offsets = [0, 96], sizes = [2, 32], strides = [1, 1]} : vector<2x416xf32> to vector<2x32xf32>
    %120 = arith.addf %118, %119 : vector<2x32xf32>
    %121 = vector.extract_strided_slice %31 {offsets = [0, 128], sizes = [2, 32], strides = [1, 1]} : vector<2x416xf32> to vector<2x32xf32>
    %122 = arith.addf %120, %121 : vector<2x32xf32>
    %123 = arith.maximumf %117, %122 : vector<2x32xf32>
    %124 = vector.extract_strided_slice %30 {offsets = [0, 64], sizes = [2, 32], strides = [1, 1]} : vector<2x416xf32> to vector<2x32xf32>
    %125 = vector.extract_strided_slice %31 {offsets = [0, 96], sizes = [2, 32], strides = [1, 1]} : vector<2x416xf32> to vector<2x32xf32>
    %126 = arith.addf %124, %125 : vector<2x32xf32>
    %127 = vector.extract_strided_slice %32 {offsets = [0, 128], sizes = [2, 32], strides = [1, 1]} : vector<2x416xf32> to vector<2x32xf32>
    %128 = arith.addf %126, %127 : vector<2x32xf32>
    %129 = arith.maximumf %123, %128 : vector<2x32xf32>
    %130 = vector.extract_strided_slice %31 {offsets = [0, 64], sizes = [2, 32], strides = [1, 1]} : vector<2x416xf32> to vector<2x32xf32>
    %131 = vector.extract_strided_slice %32 {offsets = [0, 96], sizes = [2, 32], strides = [1, 1]} : vector<2x416xf32> to vector<2x32xf32>
    %132 = arith.addf %130, %131 : vector<2x32xf32>
    %133 = vector.extract_strided_slice %33 {offsets = [0, 128], sizes = [2, 32], strides = [1, 1]} : vector<2x416xf32> to vector<2x32xf32>
    %134 = arith.addf %132, %133 : vector<2x32xf32>
    %135 = arith.maximumf %129, %134 : vector<2x32xf32>
    %136 = vector.extract_strided_slice %32 {offsets = [0, 64], sizes = [2, 32], strides = [1, 1]} : vector<2x416xf32> to vector<2x32xf32>
    %137 = vector.extract_strided_slice %33 {offsets = [0, 96], sizes = [2, 32], strides = [1, 1]} : vector<2x416xf32> to vector<2x32xf32>
    %138 = arith.addf %136, %137 : vector<2x32xf32>
    %139 = vector.extract_strided_slice %34 {offsets = [0, 128], sizes = [2, 32], strides = [1, 1]} : vector<2x416xf32> to vector<2x32xf32>
    %140 = arith.addf %138, %139 : vector<2x32xf32>
    %141 = arith.maximumf %135, %140 : vector<2x32xf32>
    %142 = vector.extract_strided_slice %33 {offsets = [0, 64], sizes = [2, 32], strides = [1, 1]} : vector<2x416xf32> to vector<2x32xf32>
    %143 = vector.extract_strided_slice %34 {offsets = [0, 96], sizes = [2, 32], strides = [1, 1]} : vector<2x416xf32> to vector<2x32xf32>
    %144 = arith.addf %142, %143 : vector<2x32xf32>
    %145 = vector.extract_strided_slice %35 {offsets = [0, 128], sizes = [2, 32], strides = [1, 1]} : vector<2x416xf32> to vector<2x32xf32>
    %146 = arith.addf %144, %145 : vector<2x32xf32>
    %147 = arith.maximumf %141, %146 : vector<2x32xf32>
    %148 = vector.extract_strided_slice %34 {offsets = [0, 64], sizes = [2, 32], strides = [1, 1]} : vector<2x416xf32> to vector<2x32xf32>
    %149 = vector.extract_strided_slice %35 {offsets = [0, 96], sizes = [2, 32], strides = [1, 1]} : vector<2x416xf32> to vector<2x32xf32>
    %150 = arith.addf %148, %149 : vector<2x32xf32>
    %151 = vector.extract_strided_slice %36 {offsets = [0, 128], sizes = [2, 32], strides = [1, 1]} : vector<2x416xf32> to vector<2x32xf32>
    %152 = arith.addf %150, %151 : vector<2x32xf32>
    %153 = arith.maximumf %147, %152 : vector<2x32xf32>
    %154 = vector.extract_strided_slice %35 {offsets = [0, 64], sizes = [2, 32], strides = [1, 1]} : vector<2x416xf32> to vector<2x32xf32>
    %155 = vector.extract_strided_slice %36 {offsets = [0, 96], sizes = [2, 32], strides = [1, 1]} : vector<2x416xf32> to vector<2x32xf32>
    %156 = arith.addf %154, %155 : vector<2x32xf32>
    %157 = vector.extract_strided_slice %37 {offsets = [0, 128], sizes = [2, 32], strides = [1, 1]} : vector<2x416xf32> to vector<2x32xf32>
    %158 = arith.addf %156, %157 : vector<2x32xf32>
    %159 = arith.maximumf %153, %158 : vector<2x32xf32>
    %160 = vector.extract_strided_slice %36 {offsets = [0, 64], sizes = [2, 32], strides = [1, 1]} : vector<2x416xf32> to vector<2x32xf32>
    %161 = vector.extract_strided_slice %37 {offsets = [0, 96], sizes = [2, 32], strides = [1, 1]} : vector<2x416xf32> to vector<2x32xf32>
    %162 = arith.addf %160, %161 : vector<2x32xf32>
    %163 = vector.extract_strided_slice %38 {offsets = [0, 128], sizes = [2, 32], strides = [1, 1]} : vector<2x416xf32> to vector<2x32xf32>
    %164 = arith.addf %162, %163 : vector<2x32xf32>
    %165 = arith.maximumf %159, %164 : vector<2x32xf32>
    %166 = vector.extract_strided_slice %37 {offsets = [0, 64], sizes = [2, 32], strides = [1, 1]} : vector<2x416xf32> to vector<2x32xf32>
    %167 = vector.extract_strided_slice %38 {offsets = [0, 96], sizes = [2, 32], strides = [1, 1]} : vector<2x416xf32> to vector<2x32xf32>
    %168 = arith.addf %166, %167 : vector<2x32xf32>
    %169 = vector.extract_strided_slice %39 {offsets = [0, 128], sizes = [2, 32], strides = [1, 1]} : vector<2x416xf32> to vector<2x32xf32>
    %170 = arith.addf %168, %169 : vector<2x32xf32>
    %171 = arith.maximumf %165, %170 : vector<2x32xf32>
    %172 = vector.extract_strided_slice %38 {offsets = [0, 64], sizes = [2, 32], strides = [1, 1]} : vector<2x416xf32> to vector<2x32xf32>
    %173 = vector.extract_strided_slice %39 {offsets = [0, 96], sizes = [2, 32], strides = [1, 1]} : vector<2x416xf32> to vector<2x32xf32>
    %174 = arith.addf %172, %173 : vector<2x32xf32>
    %175 = vector.extract_strided_slice %40 {offsets = [0, 128], sizes = [2, 32], strides = [1, 1]} : vector<2x416xf32> to vector<2x32xf32>
    %176 = arith.addf %174, %175 : vector<2x32xf32>
    %177 = arith.maximumf %171, %176 : vector<2x32xf32>
    %178 = vector.extract_strided_slice %39 {offsets = [0, 64], sizes = [2, 32], strides = [1, 1]} : vector<2x416xf32> to vector<2x32xf32>
    %179 = vector.extract_strided_slice %40 {offsets = [0, 96], sizes = [2, 32], strides = [1, 1]} : vector<2x416xf32> to vector<2x32xf32>
    %180 = arith.addf %178, %179 : vector<2x32xf32>
    %181 = vector.extract_strided_slice %41 {offsets = [0, 128], sizes = [2, 32], strides = [1, 1]} : vector<2x416xf32> to vector<2x32xf32>
    %182 = arith.addf %180, %181 : vector<2x32xf32>
    %183 = arith.maximumf %177, %182 : vector<2x32xf32>
    %184 = vector.extract_strided_slice %26 {offsets = [0, 160], sizes = [2, 64], strides = [1, 1]} : vector<2x416xf32> to vector<2x64xf32>
    %185 = vector.extract_strided_slice %27 {offsets = [0, 224], sizes = [2, 64], strides = [1, 1]} : vector<2x416xf32> to vector<2x64xf32>
    %186 = arith.addf %184, %185 : vector<2x64xf32>
    %187 = vector.extract_strided_slice %28 {offsets = [0, 288], sizes = [2, 64], strides = [1, 1]} : vector<2x416xf32> to vector<2x64xf32>
    %188 = arith.addf %186, %187 : vector<2x64xf32>
    %189 = vector.extract_strided_slice %29 {offsets = [0, 352], sizes = [2, 64], strides = [1, 1]} : vector<2x416xf32> to vector<2x64xf32>
    %190 = arith.addf %188, %189 : vector<2x64xf32>
    %191 = vector.extract_strided_slice %27 {offsets = [0, 160], sizes = [2, 64], strides = [1, 1]} : vector<2x416xf32> to vector<2x64xf32>
    %192 = vector.extract_strided_slice %28 {offsets = [0, 224], sizes = [2, 64], strides = [1, 1]} : vector<2x416xf32> to vector<2x64xf32>
    %193 = arith.addf %191, %192 : vector<2x64xf32>
    %194 = vector.extract_strided_slice %29 {offsets = [0, 288], sizes = [2, 64], strides = [1, 1]} : vector<2x416xf32> to vector<2x64xf32>
    %195 = arith.addf %193, %194 : vector<2x64xf32>
    %196 = vector.extract_strided_slice %30 {offsets = [0, 352], sizes = [2, 64], strides = [1, 1]} : vector<2x416xf32> to vector<2x64xf32>
    %197 = arith.addf %195, %196 : vector<2x64xf32>
    %198 = arith.maximumf %190, %197 : vector<2x64xf32>
    %199 = vector.extract_strided_slice %28 {offsets = [0, 160], sizes = [2, 64], strides = [1, 1]} : vector<2x416xf32> to vector<2x64xf32>
    %200 = vector.extract_strided_slice %29 {offsets = [0, 224], sizes = [2, 64], strides = [1, 1]} : vector<2x416xf32> to vector<2x64xf32>
    %201 = arith.addf %199, %200 : vector<2x64xf32>
    %202 = vector.extract_strided_slice %30 {offsets = [0, 288], sizes = [2, 64], strides = [1, 1]} : vector<2x416xf32> to vector<2x64xf32>
    %203 = arith.addf %201, %202 : vector<2x64xf32>
    %204 = vector.extract_strided_slice %31 {offsets = [0, 352], sizes = [2, 64], strides = [1, 1]} : vector<2x416xf32> to vector<2x64xf32>
    %205 = arith.addf %203, %204 : vector<2x64xf32>
    %206 = arith.maximumf %198, %205 : vector<2x64xf32>
    %207 = vector.extract_strided_slice %29 {offsets = [0, 160], sizes = [2, 64], strides = [1, 1]} : vector<2x416xf32> to vector<2x64xf32>
    %208 = vector.extract_strided_slice %30 {offsets = [0, 224], sizes = [2, 64], strides = [1, 1]} : vector<2x416xf32> to vector<2x64xf32>
    %209 = arith.addf %207, %208 : vector<2x64xf32>
    %210 = vector.extract_strided_slice %31 {offsets = [0, 288], sizes = [2, 64], strides = [1, 1]} : vector<2x416xf32> to vector<2x64xf32>
    %211 = arith.addf %209, %210 : vector<2x64xf32>
    %212 = vector.extract_strided_slice %32 {offsets = [0, 352], sizes = [2, 64], strides = [1, 1]} : vector<2x416xf32> to vector<2x64xf32>
    %213 = arith.addf %211, %212 : vector<2x64xf32>
    %214 = arith.maximumf %206, %213 : vector<2x64xf32>
    %215 = vector.extract_strided_slice %30 {offsets = [0, 160], sizes = [2, 64], strides = [1, 1]} : vector<2x416xf32> to vector<2x64xf32>
    %216 = vector.extract_strided_slice %31 {offsets = [0, 224], sizes = [2, 64], strides = [1, 1]} : vector<2x416xf32> to vector<2x64xf32>
    %217 = arith.addf %215, %216 : vector<2x64xf32>
    %218 = vector.extract_strided_slice %32 {offsets = [0, 288], sizes = [2, 64], strides = [1, 1]} : vector<2x416xf32> to vector<2x64xf32>
    %219 = arith.addf %217, %218 : vector<2x64xf32>
    %220 = vector.extract_strided_slice %33 {offsets = [0, 352], sizes = [2, 64], strides = [1, 1]} : vector<2x416xf32> to vector<2x64xf32>
    %221 = arith.addf %219, %220 : vector<2x64xf32>
    %222 = arith.maximumf %214, %221 : vector<2x64xf32>
    %223 = vector.extract_strided_slice %31 {offsets = [0, 160], sizes = [2, 64], strides = [1, 1]} : vector<2x416xf32> to vector<2x64xf32>
    %224 = vector.extract_strided_slice %32 {offsets = [0, 224], sizes = [2, 64], strides = [1, 1]} : vector<2x416xf32> to vector<2x64xf32>
    %225 = arith.addf %223, %224 : vector<2x64xf32>
    %226 = vector.extract_strided_slice %33 {offsets = [0, 288], sizes = [2, 64], strides = [1, 1]} : vector<2x416xf32> to vector<2x64xf32>
    %227 = arith.addf %225, %226 : vector<2x64xf32>
    %228 = vector.extract_strided_slice %34 {offsets = [0, 352], sizes = [2, 64], strides = [1, 1]} : vector<2x416xf32> to vector<2x64xf32>
    %229 = arith.addf %227, %228 : vector<2x64xf32>
    %230 = arith.maximumf %222, %229 : vector<2x64xf32>
    %231 = vector.extract_strided_slice %32 {offsets = [0, 160], sizes = [2, 64], strides = [1, 1]} : vector<2x416xf32> to vector<2x64xf32>
    %232 = vector.extract_strided_slice %33 {offsets = [0, 224], sizes = [2, 64], strides = [1, 1]} : vector<2x416xf32> to vector<2x64xf32>
    %233 = arith.addf %231, %232 : vector<2x64xf32>
    %234 = vector.extract_strided_slice %34 {offsets = [0, 288], sizes = [2, 64], strides = [1, 1]} : vector<2x416xf32> to vector<2x64xf32>
    %235 = arith.addf %233, %234 : vector<2x64xf32>
    %236 = vector.extract_strided_slice %35 {offsets = [0, 352], sizes = [2, 64], strides = [1, 1]} : vector<2x416xf32> to vector<2x64xf32>
    %237 = arith.addf %235, %236 : vector<2x64xf32>
    %238 = arith.maximumf %230, %237 : vector<2x64xf32>
    %239 = vector.extract_strided_slice %33 {offsets = [0, 160], sizes = [2, 64], strides = [1, 1]} : vector<2x416xf32> to vector<2x64xf32>
    %240 = vector.extract_strided_slice %34 {offsets = [0, 224], sizes = [2, 64], strides = [1, 1]} : vector<2x416xf32> to vector<2x64xf32>
    %241 = arith.addf %239, %240 : vector<2x64xf32>
    %242 = vector.extract_strided_slice %35 {offsets = [0, 288], sizes = [2, 64], strides = [1, 1]} : vector<2x416xf32> to vector<2x64xf32>
    %243 = arith.addf %241, %242 : vector<2x64xf32>
    %244 = vector.extract_strided_slice %36 {offsets = [0, 352], sizes = [2, 64], strides = [1, 1]} : vector<2x416xf32> to vector<2x64xf32>
    %245 = arith.addf %243, %244 : vector<2x64xf32>
    %246 = arith.maximumf %238, %245 : vector<2x64xf32>
    %247 = vector.extract_strided_slice %34 {offsets = [0, 160], sizes = [2, 64], strides = [1, 1]} : vector<2x416xf32> to vector<2x64xf32>
    %248 = vector.extract_strided_slice %35 {offsets = [0, 224], sizes = [2, 64], strides = [1, 1]} : vector<2x416xf32> to vector<2x64xf32>
    %249 = arith.addf %247, %248 : vector<2x64xf32>
    %250 = vector.extract_strided_slice %36 {offsets = [0, 288], sizes = [2, 64], strides = [1, 1]} : vector<2x416xf32> to vector<2x64xf32>
    %251 = arith.addf %249, %250 : vector<2x64xf32>
    %252 = vector.extract_strided_slice %37 {offsets = [0, 352], sizes = [2, 64], strides = [1, 1]} : vector<2x416xf32> to vector<2x64xf32>
    %253 = arith.addf %251, %252 : vector<2x64xf32>
    %254 = arith.maximumf %246, %253 : vector<2x64xf32>
    %255 = vector.extract_strided_slice %35 {offsets = [0, 160], sizes = [2, 64], strides = [1, 1]} : vector<2x416xf32> to vector<2x64xf32>
    %256 = vector.extract_strided_slice %36 {offsets = [0, 224], sizes = [2, 64], strides = [1, 1]} : vector<2x416xf32> to vector<2x64xf32>
    %257 = arith.addf %255, %256 : vector<2x64xf32>
    %258 = vector.extract_strided_slice %37 {offsets = [0, 288], sizes = [2, 64], strides = [1, 1]} : vector<2x416xf32> to vector<2x64xf32>
    %259 = arith.addf %257, %258 : vector<2x64xf32>
    %260 = vector.extract_strided_slice %38 {offsets = [0, 352], sizes = [2, 64], strides = [1, 1]} : vector<2x416xf32> to vector<2x64xf32>
    %261 = arith.addf %259, %260 : vector<2x64xf32>
    %262 = arith.maximumf %254, %261 : vector<2x64xf32>
    %263 = vector.extract_strided_slice %36 {offsets = [0, 160], sizes = [2, 64], strides = [1, 1]} : vector<2x416xf32> to vector<2x64xf32>
    %264 = vector.extract_strided_slice %37 {offsets = [0, 224], sizes = [2, 64], strides = [1, 1]} : vector<2x416xf32> to vector<2x64xf32>
    %265 = arith.addf %263, %264 : vector<2x64xf32>
    %266 = vector.extract_strided_slice %38 {offsets = [0, 288], sizes = [2, 64], strides = [1, 1]} : vector<2x416xf32> to vector<2x64xf32>
    %267 = arith.addf %265, %266 : vector<2x64xf32>
    %268 = vector.extract_strided_slice %39 {offsets = [0, 352], sizes = [2, 64], strides = [1, 1]} : vector<2x416xf32> to vector<2x64xf32>
    %269 = arith.addf %267, %268 : vector<2x64xf32>
    %270 = arith.maximumf %262, %269 : vector<2x64xf32>
    %271 = vector.extract_strided_slice %37 {offsets = [0, 160], sizes = [2, 64], strides = [1, 1]} : vector<2x416xf32> to vector<2x64xf32>
    %272 = vector.extract_strided_slice %38 {offsets = [0, 224], sizes = [2, 64], strides = [1, 1]} : vector<2x416xf32> to vector<2x64xf32>
    %273 = arith.addf %271, %272 : vector<2x64xf32>
    %274 = vector.extract_strided_slice %39 {offsets = [0, 288], sizes = [2, 64], strides = [1, 1]} : vector<2x416xf32> to vector<2x64xf32>
    %275 = arith.addf %273, %274 : vector<2x64xf32>
    %276 = vector.extract_strided_slice %40 {offsets = [0, 352], sizes = [2, 64], strides = [1, 1]} : vector<2x416xf32> to vector<2x64xf32>
    %277 = arith.addf %275, %276 : vector<2x64xf32>
    %278 = arith.maximumf %270, %277 : vector<2x64xf32>
    %279 = vector.extract_strided_slice %38 {offsets = [0, 160], sizes = [2, 64], strides = [1, 1]} : vector<2x416xf32> to vector<2x64xf32>
    %280 = vector.extract_strided_slice %39 {offsets = [0, 224], sizes = [2, 64], strides = [1, 1]} : vector<2x416xf32> to vector<2x64xf32>
    %281 = arith.addf %279, %280 : vector<2x64xf32>
    %282 = vector.extract_strided_slice %40 {offsets = [0, 288], sizes = [2, 64], strides = [1, 1]} : vector<2x416xf32> to vector<2x64xf32>
    %283 = arith.addf %281, %282 : vector<2x64xf32>
    %284 = vector.extract_strided_slice %41 {offsets = [0, 352], sizes = [2, 64], strides = [1, 1]} : vector<2x416xf32> to vector<2x64xf32>
    %285 = arith.addf %283, %284 : vector<2x64xf32>
    %286 = arith.maximumf %278, %285 : vector<2x64xf32>
    %287 = tpu.concatenate %100, %183, %286 in 1 : vector<2x32xf32>, vector<2x32xf32>, vector<2x64xf32> -> vector<2x128xf32>
    %c0_3 = arith.constant 0 : index
    %c0_4 = arith.constant 0 : index
    %288 = vector.load %arg3[%c0_3, %c0_4] : memref<1x128xf32, #tpu.memory_space<vmem>>, vector<1x128xf32>
    %289 = vector.broadcast %288 : vector<1x128xf32> to vector<2x128xf32>
    %290 = arith.addf %287, %289 : vector<2x128xf32>
    %291 = math.tanh %290 : vector<2x128xf32>
    %c0_5 = arith.constant 0 : index
    %c0_6 = arith.constant 0 : index
    %292 = vector.load %arg4[%c0_5, %c0_6] : memref<2x128xf32, #tpu.memory_space<vmem>>, vector<2x128xf32>
    tpu.vector_store %arg4[%c0_5, %c0_6], %291 {strides = array<i32>} : memref<2x128xf32, #tpu.memory_space<vmem>>, vector<2x128xf32>,
    return
  }
  func.func @transform_0(%arg0: i32) -> (i32, i32) {
    %c0_i32 = arith.constant 0 : i32
    %c0_i32_0 = arith.constant 0 : i32
    return %arg0, %c0_i32 : i32, i32
  }
  func.func @transform_1(%arg0: i32) -> (i32, i32) {
    %c0_i32 = arith.constant 0 : i32
    %c0_i32_0 = arith.constant 0 : i32
    %c0_i32_1 = arith.constant 0 : i32
    return %c0_i32, %c0_i32_0 : i32, i32
  }
  func.func @transform_2(%arg0: i32) -> (i32, i32) {
    %c0_i32 = arith.constant 0 : i32
    %c0_i32_0 = arith.constant 0 : i32
    %c0_i32_1 = arith.constant 0 : i32
    return %c0_i32, %c0_i32_0 : i32, i32
  }
  func.func @transform_3(%arg0: i32) -> (i32, i32) {
    %c0_i32 = arith.constant 0 : i32
    %c0_i32_0 = arith.constant 0 : i32
    return %arg0, %c0_i32 : i32, i32
  }
}

</mosaic_0001>

<bundles_post_ra>
// kernel: tpu_custom_call.1
= control target key start
LH: loop header
LB: loop body
LE: loop exit
PB: predicated region body
PF: predicated region fallthrough
CT: control target
= control target key end

     0   :  { %8 = vsyncpa [#allocation3], 0  ;;  %s985_s0 = inlined_call_operand.hbm [shape: s32[2,16], index: 0, kind: input, shape index: {}]   ;;  %s986_s1 = inlined_call_operand.hbm [shape: bf16[64,416], index: 1, kind: input, shape index: {}]   ;;  %s987_s2 = inlined_call_operand.vmem [shape: f32[1,128], index: 2, kind: input, shape index: {}]   ;;  %s988_s3 = inlined_call_operand.hbm [shape: f32[2,128], index: 3, kind: output, shape index: {}]  }
   0x1   :  { %9 = vsyncpa [#allocation6], 0 }
   0x2   :  { %10 = vsyncpa [#allocation4], 0  ;;  %s801_s12 = smov [#allocation2]   ;;  %s802_s14 = smov [#allocation5]  }
   0x3   :  { %s17_s13 = sshll.u32 %s801_s12, 4  ;;  %s26_s15 = sshll.u32 %s802_s14, 4  ;;  %s18_s13 = int_to_ptr.vmem [resolvable:$true] %s17_s13  ;;  %s27_s15 = int_to_ptr.vmem [resolvable:$true] %s26_s15 }
   0x4   :  { %s743_s16 = scalar_lea.vmem %s18_s13, 32  ;;  %p748_p1 = scmp.lt.s32.totalorder %s18_s13, %s18_s13 }
   0x5   :  { %p744_p0 = scmp.ne.s32.totalorder %s18_s13, %s743_s16  ;;  %p749_p2 = scmp.lt.s32.totalorder %s743_s16, %s743_s16 }
   0x7   :  { %p750_p3 = por %p749_p2, %p748_p1 }
   0x9   :  { %p751_p4 = pnand %p750_p3, %p744_p0 }
   0xb   :  { %754 = shalt.err (!%p751_p4)
}
   0xc   :  { %20 = dma.hbm_to_vmem [thread:$0]  %s985_s0, 32, %s18_s13, [#allocation3]  }
   0xd   :  { %s763_s19 = scalar_lea.vmem %s27_s15, 2048  ;;  %p768_p6 = scmp.lt.s32.totalorder %s27_s15, %s27_s15 }
   0xe   :  { %p764_p5 = scmp.ne.s32.totalorder %s27_s15, %s763_s19  ;;  %p769_p7 = scmp.lt.s32.totalorder %s763_s19, %s763_s19 }
  0x10   :  { %p770_p8 = por %p769_p7, %p768_p6 }
  0x12   :  { %p771_p9 = pnand %p770_p8, %p764_p5 }
  0x14   :  { %774 = shalt.err (!%p771_p9)
}
  0x15   :  { %s803_s20 = smov 256   ;;  %s804_s21 = smov 16  }
  0x16   :  { %32 = dma.hbm_to_vmem [thread:$0]  %s986_s1, 2048, %s27_s15, [#allocation6], %s803_s20, %s803_s20, %s804_s21  }
  0x17   :  { %795 = dma.done.wait [#allocation3], 32  }
  0x18   :  { %796 = vsyncadd [#allocation3], 4294967264 }
  0x19   :  { %797 = dma.done.wait [#allocation6], 2048  }
  0x1a   :  { %798 = vsyncadd [#allocation6], 4294965248  ;;  %v805_v0 = vmov 0   ;;  %v856_v1 = vld [vmem:[#allocation2] sm:$0x3]  ;;  %s806_s0 = smov 124   ;;  %v91_v48 = vlaneseq }
  0x1b   :  { %707 = vset.pattern.permute.xlu1 %v805_v0  ;;  %708 = vset.pattern.permute.xlu0 %v805_v0  ;;  %v43_v2 = vrot.slane %v856_v1, 6  ;;  %s807_s1 = smov 123   ;;  %v46_v3 = vrot.slane %v856_v1, 4  ;;  %s808_s24 = smov 127   ;;  %v49_v4 = vrot.slane %v856_v1, 2  ;;  %vm76_vm0 = vcmask 1041408  }
  0x1c   :  { %254 = vmatprep.mubr.bf16.mxu0 %v805_v0  ;;  %307 = vmatprep.mubr.bf16.mxu1 %v805_v0  ;;  %s809_s25 = smov 126   ;;  %s810_s26 = smov 122   ;;  %v709_v5 = vld [vmem:[#allocation5 + $0x64] ss:$16 sps:$4 sm:$0xff]   ;;  %v711_v6 = vld [vmem:[#allocation5 + $0x6c] ss:$16 sps:$4 sm:$0xff]  }
  0x1d   :  { %52 = vrot.lane.b32.xlu0 %v856_v1, %s806_s0  ;;  %54 = vrot.lane.b32.xlu1 %v43_v2, %s807_s1  ;;  %s811_s27 = smov 125   ;;  %s812_s28 = smov 121   ;;  %v713_v7 = vld [vmem:[#allocation5 + $0x60] ss:$16 sps:$4 sm:$0xff]   ;;  %v714_v8 = vld [vmem:[#allocation5 + $0x68] ss:$16 sps:$4 sm:$0xff]  }
  0x1e   :  { %s813_s29 = smov 120   ;;  %s814_s30 = smov 119   ;;  %v715_v9 = vld [vmem:[#allocation5 + $0x44] ss:$16 sps:$4 sm:$0xff]   ;;  %v717_v10 = vld [vmem:[#allocation5 + $0x4c] ss:$16 sps:$4 sm:$0xff]   ;;  %230 = vmatprep.subr.bf16.mxu0 %v709_v5  ;;  %283 = vmatprep.subr.bf16.mxu1 %v711_v6 }
  0x1f   :  { %s815_s4 = smov 116   ;;  %s816_s5 = smov 115   ;;  %231 = vmatpush1.bf16.msra.mxu0 %v713_v7  ;;  %v719_v11 = vld [vmem:[#allocation5 + $0x40] ss:$16 sps:$4 sm:$0xff]   ;;  %284 = vmatpush1.bf16.msra.mxu1 %v714_v8  ;;  %v720_v12 = vld [vmem:[#allocation5 + $0x48] ss:$16 sps:$4 sm:$0xff]  }
  0x20   :  { %s817_s6 = smov 118   ;;  %232 = vmatprep.subr.bf16.mxu0 %v715_v9  ;;  %285 = vmatprep.subr.bf16.mxu1 %v717_v10  ;;  %v721_v13 = vld [vmem:[#allocation5 + $0x24] ss:$16 sps:$4 sm:$0xff]   ;;  %v723_v14 = vld [vmem:[#allocation5 + $0x2c] ss:$16 sps:$4 sm:$0xff]   ;;  %s818_s7 = smov 114  }
  0x21   :  { %44 = vrot.lane.b32.xlu0 %v43_v2, %s808_s24  ;;  %47 = vrot.lane.b32.xlu1 %v46_v3, %s809_s25  ;;  %v725_v15 = vld [vmem:[#allocation5 + $0x20] ss:$16 sps:$4 sm:$0xff]   ;;  %s819_s8 = smov 117   ;;  %v726_v16 = vld [vmem:[#allocation5 + $0x28] ss:$16 sps:$4 sm:$0xff]   ;;  %s820_s9 = smov 113  }
  0x22   :  { %vm78_vm1 = vcmask 1043456   ;;  %vm80_vm2 = vcmask 1045504   ;;  %v727_v23 = vld [vmem:[#allocation5 + $0x4] ss:$16 sps:$4 sm:$0xff]   ;;  %v729_v24 = vld [vmem:[#allocation5 + $0xc] ss:$16 sps:$4 sm:$0xff]  }
  0x23   :  { %233 = vmatpush1.bf16.msra.mxu0 %v719_v11  ;;  %286 = vmatpush1.bf16.msra.mxu1 %v720_v12  ;;  %v731_v25 = vld [vmem:[#allocation5] ss:$16 sps:$4 sm:$0xff]   ;;  %v732_v26 = vld [vmem:[#allocation5 + $0x8] ss:$16 sps:$4 sm:$0xff]   ;;  %v92_v49 = vand.u32 127, %v91_v48  ;;  %v821_v52 = vmov 0.0  }
  0x24   :  { %234 = vmatprep.subr.bf16.mxu0 %v721_v13  ;;  %287 = vmatprep.subr.bf16.mxu1 %v723_v14  ;;  %vm215_vm5 = vcmask 523264   ;;  %s822_s10 = smov 96   ;;  %s823_s11 = smov 64   ;;  %vm628_vm8 = vcmask 261120  }
  0x25   :  { %56 = vrot.lane.b32.xlu0 %v46_v3, %s810_s26  ;;  %50 = vrot.lane.b32.xlu1 %v49_v4, %s811_s27  ;;  %s824_s12 = smov 32   ;;  %s825_s15 = smov [#allocation7]  }
  0x26   :  { %s647_s16 = sshll.u32 %s825_s15, 4  ;;  %s648_s16 = int_to_ptr.vmem [resolvable:$true] %s647_s16 }
  0x27   :  { %235 = vmatpush1.bf16.msra.mxu0 %v725_v15  ;;  %288 = vmatpush1.bf16.msra.mxu1 %v726_v16  ;;  %s775_s17 = scalar_lea.vmem %s648_s16, 32  ;;  %p780_p11 = scmp.lt.s32.totalorder %s648_s16, %s648_s16 }
  0x28   :  { %236 = vmatprep.subr.bf16.mxu0 %v727_v23  ;;  %289 = vmatprep.subr.bf16.mxu1 %v729_v24  ;;  %p776_p10 = scmp.ne.s32.totalorder %s648_s16, %s775_s17  ;;  %p781_p12 = scmp.lt.s32.totalorder %s775_s17, %s775_s17 }
  0x29   :  { %58 = vrot.lane.b32.xlu0 %v49_v4, %s812_s28  ;;  %60 = vrot.lane.b32.xlu1 %v856_v1, %s813_s29 }
  0x2a   :  { %p782_p13 = por %p781_p12, %p780_p11 }
  0x2b   :  { %237 = vmatpush1.bf16.msra.mxu0 %v731_v25  ;;  %290 = vmatpush1.bf16.msra.mxu1 %v732_v26 }
  0x2c   :  { %p783_p0 = pnand %p782_p13, %p776_p10 }
  0x2d   :  { %62 = vrot.lane.b32.xlu0 %v43_v2, %s814_s30  ;;  %68 = vrot.lane.b32.xlu1 %v856_v1, %s815_s4 }
  0x31   :  { %70 = vrot.lane.b32.xlu0 %v43_v2, %s816_s5  ;;  %64 = vrot.lane.b32.xlu1 %v46_v3, %s817_s6 }
  0x35   :  { %72 = vrot.lane.b32.xlu0 %v46_v3, %s818_s7  ;;  %66 = vrot.lane.b32.xlu1 %v49_v4, %s819_s8 }
  0x39   :  { %74 = vrot.lane.b32.xlu0 %v49_v4, %s820_s9 }
  0x8f   :  { %v53_v17 = vpop.permute.xlu0 %52  ;;  %v55_v18 = vpop.permute.xlu1 %54 }
  0x90   :  { %v82_v29 = vsel %vm76_vm0, %v53_v17, %v55_v18 }
  0x93   :  { %v45_v19 = vpop.permute.xlu0 %44  ;;  %v48_v20 = vpop.permute.xlu1 %47 }
  0x94   :  { %v77_v21 = vsel %vm76_vm0, %v856_v1, %v45_v19 }
  0x95   :  { %v79_v27 = vsel %vm78_vm1, %v77_v21, %v48_v20 }
  0x97   :  { %v57_v22 = vpop.permute.xlu0 %56  ;;  %v51_v28 = vpop.permute.xlu1 %50 }
  0x98   :  { %v81_v30 = vsel %vm80_vm2, %v79_v27, %v51_v28  ;;  %v83_v31 = vsel %vm78_vm1, %v82_v29, %v57_v22 }
  0x99   :  { %94 = vperm.xlu1 %707, %v81_v30  }
  0x9b   :  { %v59_v32 = vpop.permute.xlu0 %58  ;;  %v61_v34 = vpop.permute.xlu1 %60 }
  0x9c   :  { %v84_v33 = vsel %vm80_vm2, %v83_v31, %v59_v32 }
  0x9d   :  { %97 = vperm.xlu0 %708, %v84_v33  }
  0x9f   :  { %v63_v35 = vpop.permute.xlu0 %62  ;;  %v69_v36 = vpop.permute.xlu1 %68 }
  0xa0   :  { %v85_v39 = vsel %vm76_vm0, %v61_v34, %v63_v35 }
  0xa3   :  { %v71_v37 = vpop.permute.xlu0 %70  ;;  %v65_v38 = vpop.permute.xlu1 %64 }
  0xa4   :  { %v88_v41 = vsel %vm76_vm0, %v69_v36, %v71_v37  ;;  %v86_v42 = vsel %vm78_vm1, %v85_v39, %v65_v38 }
  0xa7   :  { %v73_v40 = vpop.permute.xlu0 %72  ;;  %v67_v43 = vpop.permute.xlu1 %66 }
  0xa8   :  { %v87_v44 = vsel %vm80_vm2, %v86_v42, %v67_v43  ;;  %v89_v45 = vsel %vm78_vm1, %v88_v41, %v73_v40 }
  0xa9   :  { %100 = vperm.xlu1 %707, %v87_v44  }
  0xab   :  { %v75_v46 = vpop.permute.xlu0 %74 }
  0xac   :  { %v90_v47 = vsel %vm80_vm2, %v89_v45, %v75_v46 }
  0xad   :  { %103 = vperm.xlu1 %707, %v90_v47  }
 0x114   :  { %v95_v50 = vpop.permute.xlu1 %94 }
 0x115   :  { %vm105_vm3 = vcmp.eq.s32.totalorder %v95_v50, %v92_v49 }
 0x116   :  { %v657_v53 = vsel %vm105_vm3, 1.0, %v821_v52 }
 0x118   :  { %v98_v51 = vpop.permute.xlu0 %97 }
 0x119   :  { %vm106_vm4 = vcmp.eq.s32.totalorder %v98_v51, %v92_v49 }
 0x11a   :  { %v658_v54 = vsel %vm106_vm4, 1.0, %v821_v52 }
 0x11b   :  { %v117_v55 = vpack.c.bf16 %v658_v54, %v657_v53 }
 0x11d   :  { %677 = vmatmul.mubr.msk.bf16.vlgmr.msra.gmra.mxu0 %vm215_vm5, %v117_v55  ;;  %679 = vmatmul.mubr.msk.bf16.vlgmr.msra.gmra.mxu1 %vm215_vm5, %v117_v55 }
 0x11e   :  { %264 = vmatprep.mubr.bf16.mxu0 %v805_v0  ;;  %317 = vmatprep.mubr.bf16.mxu1 %v805_v0 }
 0x124   :  { %v101_v56 = vpop.permute.xlu1 %100 }
 0x125   :  { %vm107_vm6 = vcmp.eq.s32.totalorder %v101_v56, %v92_v49 }
 0x126   :  { %v659_v58 = vsel %vm107_vm6, 1.0, %v821_v52 }
 0x128   :  { %v104_v57 = vpop.permute.xlu1 %103 }
 0x129   :  { %vm108_vm7 = vcmp.eq.s32.totalorder %v104_v57, %v92_v49 }
 0x12a   :  { %v660_v59 = vsel %vm108_vm7, 1.0, %v821_v52 }
 0x12b   :  { %v118_v60 = vpack.c.bf16 %v660_v59, %v659_v58 }
 0x12d   :  { %678 = vmatmul.mubr.msk.bf16.gmra.mxu0 %vm215_vm5, %v118_v60  ;;  %680 = vmatmul.mubr.msk.bf16.gmra.mxu1 %vm215_vm5, %v118_v60 }
 0x1dd   :  { %v883_v61 = vpop.f32.mrf.mxu0  ;;  %v886_v63 = vpop.f32.mrf.mxu1 }
 0x1de   :  { %v329_v62 = vrot.slane %v883_v61, 2  ;;  %v473_v2 = vrot.slane %v886_v63, 2  ;;  %v485_v5 = vrot.slane %v886_v63, 6 }
 0x1df   :  { %v888_v1 = vpop.f32.mrf.mxu0  ;;  %v311_v4 = vpop.f32.mrf.mxu1 }
 0x1e0   :  { %330 = vrot.lane.b32.xlu0 %v329_v62, %s822_s10  ;;  %v472_v0 = vrot.slane %v888_v1, 2  ;;  %v399_v3 = vrot.slane %v888_v1, 4  ;;  %v486_v7 = vrot.slane %v311_v4, 6 }
 0x1e1   :  { %v898_v6 = vpop.f32.mrf.mxu0  ;;  %v901_v8 = vpop.f32.mrf.mxu1 }
 0x1e2   :  { %474 = vrot.lane.b32.xlu1 %v472_v0, %s823_s11  ;;  %v342_v9 = vrot.slane %v898_v6, 2  ;;  %v518_v10 = vrot.slane %v901_v8, 2  ;;  %v496_v12 = vrot.slane %v901_v8, 6  ;;  %v509_v60 = vrot.slane %v901_v8, 4 }
 0x1e3   :  { %v907_v11 = vpop.f32.mrf.mxu0  ;;  %v315_v14 = vpop.f32.mrf.mxu1 }
 0x1e4   :  { %476 = vrot.lane.b32.xlu0 %v473_v2, %s823_s11  ;;  %v409_v13 = vrot.slane %v907_v11, 4  ;;  %v517_v15 = vrot.slane %v907_v11, 2  ;;  %v497_v17 = vrot.slane %v315_v14, 6 }
 0x1e6   :  { %400 = vrot.lane.b32.xlu1 %v399_v3, %s823_s11 }
 0x1e8   :  { %487 = vrot.lane.b32.xlu0 %v485_v5, %s823_s11 }
 0x1ea   :  { %489 = vrot.lane.b32.xlu1 %v486_v7, %s823_s11 }
 0x1ec   :  { %343 = vrot.lane.b32.xlu0 %v342_v9, %s822_s10 }
 0x1ed   :  { %v915_v16 = vpop.f32.mrf.mxu0  ;;  %v918_v18 = vpop.f32.mrf.mxu1 }
 0x1ee   :  { %521 = vrot.lane.b32.xlu1 %v518_v10, %s823_s11  ;;  %v361_v19 = vrot.slane %v915_v16, 2  ;;  %v560_v20 = vrot.slane %v918_v18, 2  ;;  %v538_v22 = vrot.slane %v918_v18, 6 }
 0x1ef   :  { %v924_v21 = vpop.f32.mrf.mxu0  ;;  %v321_v24 = vpop.f32.mrf.mxu1 }
 0x1f0   :  { %498 = vrot.lane.b32.xlu0 %v496_v12, %s823_s11  ;;  %v430_v23 = vrot.slane %v924_v21, 4  ;;  %v559_v26 = vrot.slane %v924_v21, 2  ;;  %v539_v27 = vrot.slane %v321_v24, 6 }
 0x1f1   :  { %v930_v25 = vpop.f32.mrf.mxu0  ;;  %v935_v28 = vpop.f32.mrf.mxu1 }
 0x1f2   :  { %410 = vrot.lane.b32.xlu1 %v409_v13, %s823_s11  ;;  %v380_v30 = vrot.slane %v930_v25, 2  ;;  %v580_v33 = vrot.slane %v935_v28, 6  ;;  %v602_v36 = vrot.slane %v935_v28, 2 }
 0x1f3   :  { %v937_v29 = vpop.f32.mrf.mxu0  ;;  %v325_v32 = vpop.f32.mrf.mxu1 }
 0x1f4   :  { %519 = vrot.lane.b32.xlu0 %v517_v15, %s823_s11  ;;  %v451_v31 = vrot.slane %v937_v29, 4  ;;  %v581_v34 = vrot.slane %v325_v32, 6  ;;  %v601_v35 = vrot.slane %v937_v29, 2 }
 0x1f6   :  { %500 = vrot.lane.b32.xlu1 %v497_v17, %s823_s11 }
 0x1f8   :  { %362 = vrot.lane.b32.xlu0 %v361_v19, %s822_s10 }
 0x1fa   :  { %563 = vrot.lane.b32.xlu1 %v560_v20, %s823_s11 }
 0x1fc   :  { %540 = vrot.lane.b32.xlu0 %v538_v22, %s823_s11 }
 0x1fe   :  { %431 = vrot.lane.b32.xlu1 %v430_v23, %s823_s11 }
 0x200   :  { %561 = vrot.lane.b32.xlu0 %v559_v26, %s823_s11 }
 0x202   :  { %542 = vrot.lane.b32.xlu1 %v539_v27, %s823_s11 }
 0x204   :  { %381 = vrot.lane.b32.xlu0 %v380_v30, %s822_s10 }
 0x206   :  { %452 = vrot.lane.b32.xlu1 %v451_v31, %s823_s11 }
 0x208   :  { %582 = vrot.lane.b32.xlu0 %v580_v33, %s823_s11 }
 0x20a   :  { %584 = vrot.lane.b32.xlu1 %v581_v34, %s823_s11 }
 0x20c   :  { %603 = vrot.lane.b32.xlu0 %v601_v35, %s823_s11 }
 0x20e   :  { %605 = vrot.lane.b32.xlu1 %v602_v36, %s823_s11 }
 0x252   :  { %v331_v37 = vpop.permute.xlu0 %330 }
 0x253   :  { %v333_v39 = vadd.f32 %v331_v37, %v883_v61 }
 0x254   :  { %v475_v38 = vpop.permute.xlu1 %474 }
 0x255   :  { %v335_v42 = vrot.slane %v333_v39, 2  ;;  %v338_v48 = vrot.slane %v333_v39, 4 }
 0x256   :  { %v477_v40 = vpop.permute.xlu0 %476 }
 0x257   :  { %v337_v45 = vmax.f32 %v333_v39, %v335_v42  ;;  %v478_v50 = vsel %vm215_vm5, %v475_v38, %v477_v40 }
 0x258   :  { %v401_v41 = vpop.permute.xlu1 %400  ;;  %v480_v56 = vadd.f32 %v478_v50, %v888_v1 }
 0x259   :  { %v403_v47 = vadd.f32 %v401_v41, %v333_v39  ;;  %v340_v52 = vmax.f32 %v337_v45, %v338_v48  ;;  %v551_v45 = vrot.slane %v918_v18, 4 }
 0x25a   :  { %v488_v43 = vpop.permute.xlu0 %487  ;;  %v511_v5 = vadd.f32 %v509_v60, %v480_v56 }
 0x25b   :  { %v405_v57 = vrot.slane %v403_v47, 2 }
 0x25c   :  { %v490_v44 = vpop.permute.xlu1 %489 }
 0x25d   :  { %v407_v7 = vmax.f32 %v403_v47, %v405_v57  ;;  %v491_v13 = vsel %vm215_vm5, %v488_v43, %v490_v44 }
 0x25e   :  { %v344_v46 = vpop.permute.xlu0 %343 }
 0x25f   :  { %v346_v49 = vadd.f32 %v344_v46, %v883_v61  ;;  %v351_v54 = vadd.f32 %v344_v46, %v898_v6  ;;  %v481_v61 = vrot.slane %v886_v63, 4 }
 0x260   :  { %v522_v51 = vpop.permute.xlu1 %521 }
 0x261   :  { %v348_v53 = vrot.slane %v346_v49, 6  ;;  %v354_v4 = vrot.slane %v351_v54, 2  ;;  %v483_v12 = vadd.f32 %v481_v61, %v480_v56  ;;  %v357_v22 = vrot.slane %v351_v54, 4 }
 0x262   :  { %v499_v55 = vpop.permute.xlu0 %498 }
 0x263   :  { %v350_v58 = vmax.f32 %v340_v52, %v348_v53  ;;  %v493_v33 = vadd.f32 %v491_v13, %v483_v12 }
 0x264   :  { %v411_v59 = vpop.permute.xlu1 %410 }
 0x265   :  { %v352_v62 = vmax.f32 %v350_v58, %v351_v54  ;;  %v413_v0 = vadd.f32 %v411_v59, %v333_v39  ;;  %v418_v2 = vadd.f32 %v411_v59, %v346_v49  ;;  %v423_v36 = vadd.f32 %v411_v59, %v351_v54 }
 0x266   :  { %v520_v3 = vpop.permute.xlu0 %519 }
 0x267   :  { %v415_v9 = vrot.slane %v413_v0, 4  ;;  %v523_v10 = vsel %vm215_vm5, %v520_v3, %v522_v51  ;;  %v356_v17 = vmax.f32 %v352_v62, %v354_v4  ;;  %v420_v19 = vrot.slane %v418_v2, 6 }
 0x268   :  { %v525_v14 = vadd.f32 %v523_v10, %v888_v1  ;;  %v501_v15 = vpop.permute.xlu1 %500  ;;  %v532_v23 = vadd.f32 %v523_v10, %v907_v11 }
 0x269   :  { %v417_v8 = vmax.f32 %v407_v7, %v415_v9  ;;  %v502_v20 = vsel %vm215_vm5, %v499_v55, %v501_v15  ;;  %v359_v31 = vmax.f32 %v356_v17, %v357_v22 }
 0x26a   :  { %v526_v63 = vadd.f32 %v525_v14, %v509_v60  ;;  %v504_v24 = vadd.f32 %v502_v20, %v483_v12  ;;  %v363_v26 = vpop.permute.xlu0 %362  ;;  %v512_v30 = vadd.f32 %v511_v5, %v502_v20  ;;  %v533_v38 = vadd.f32 %v532_v23, %v509_v60 }
 0x26b   :  { %v422_v27 = vmax.f32 %v417_v8, %v420_v19  ;;  %v365_v32 = vadd.f32 %v363_v26, %v898_v6  ;;  %v370_v41 = vadd.f32 %v363_v26, %v915_v16  ;;  %v426_v6 = vrot.slane %v423_v36, 2 }
 0x26c   :  { %v506_v34 = vrot.slane %v504_v24, 2  ;;  %v527_v1 = vadd.f32 %v526_v63, %v502_v20  ;;  %v564_v35 = vpop.permute.xlu1 %563  ;;  %v514_v40 = vrot.slane %v512_v30, 4  ;;  %v534_v53 = vadd.f32 %v533_v38, %v502_v20 }
 0x26d   :  { %v367_v37 = vrot.slane %v365_v32, 6  ;;  %v424_v43 = vmax.f32 %v422_v27, %v423_v36  ;;  %v373_v56 = vrot.slane %v370_v41, 2  ;;  %v553_v58 = vadd.f32 %v551_v45, %v532_v23 }
 0x26e   :  { %v508_v39 = vmax.f32 %v493_v33, %v506_v34  ;;  %v541_v42 = vpop.permute.xlu0 %540  ;;  %v529_v47 = vrot.slane %v527_v1, 6  ;;  %v376_v61 = vrot.slane %v370_v41, 4 }
 0x26f   :  { %v369_v44 = vmax.f32 %v359_v31, %v367_v37  ;;  %v428_v57 = vmax.f32 %v424_v43, %v426_v6 }
 0x270   :  { %v516_v46 = vmax.f32 %v508_v39, %v514_v40  ;;  %v432_v48 = vpop.permute.xlu1 %431 }
 0x271   :  { %v371_v49 = vmax.f32 %v369_v44, %v370_v41  ;;  %v434_v50 = vadd.f32 %v432_v48, %v351_v54  ;;  %v439_v51 = vadd.f32 %v432_v48, %v365_v32  ;;  %v444_v5 = vadd.f32 %v432_v48, %v370_v41 }
 0x272   :  { %v531_v52 = vmax.f32 %v516_v46, %v529_v47  ;;  %v562_v55 = vpop.permute.xlu0 %561 }
 0x273   :  { %v436_v59 = vrot.slane %v434_v50, 4  ;;  %v565_v60 = vsel %vm215_vm5, %v562_v55, %v564_v35  ;;  %v375_v2 = vmax.f32 %v371_v49, %v373_v56  ;;  %v441_v4 = vrot.slane %v439_v51, 6 }
 0x274   :  { %v535_v62 = vmax.f32 %v531_v52, %v534_v53  ;;  %v567_v0 = vadd.f32 %v565_v60, %v907_v11  ;;  %v543_v18 = vpop.permute.xlu1 %542  ;;  %v574_v9 = vadd.f32 %v565_v60, %v924_v21  ;;  %v593_v11 = vrot.slane %v935_v28, 4 }
 0x275   :  { %v438_v3 = vmax.f32 %v428_v57, %v436_v59  ;;  %v544_v54 = vsel %vm215_vm5, %v541_v42, %v543_v18  ;;  %v378_v15 = vmax.f32 %v375_v2, %v376_v61  ;;  %v447_v23 = vrot.slane %v444_v5, 2 }
 0x276   :  { %v568_v7 = vadd.f32 %v567_v0, %v551_v45  ;;  %v546_v10 = vadd.f32 %v544_v54, %v533_v38  ;;  %v382_v12 = vpop.permute.xlu0 %381  ;;  %v554_v14 = vadd.f32 %v553_v58, %v544_v54  ;;  %v575_v27 = vadd.f32 %v574_v9, %v551_v45 }
 0x277   :  { %v443_v13 = vmax.f32 %v438_v3, %v441_v4  ;;  %v384_v17 = vadd.f32 %v382_v12, %v915_v16  ;;  %v389_v20 = vadd.f32 %v382_v12, %v930_v25  ;;  %v595_v1 = vadd.f32 %v593_v11, %v574_v9 }
 0x278   :  { %v548_v8 = vrot.slane %v546_v10, 2  ;;  %v569_v19 = vadd.f32 %v568_v7, %v544_v54  ;;  %v453_v22 = vpop.permute.xlu1 %452  ;;  %v556_v31 = vrot.slane %v554_v14, 4  ;;  %v576_v44 = vadd.f32 %v575_v27, %v544_v54 }
 0x279   :  { %v445_v63 = vmax.f32 %v443_v13, %v444_v5  ;;  %v386_v24 = vrot.slane %v384_v17, 6  ;;  %v455_v26 = vadd.f32 %v453_v22, %v370_v41  ;;  %v460_v32 = vadd.f32 %v453_v22, %v384_v17 }
 0x27a   :  { %v550_v30 = vmax.f32 %v535_v62, %v548_v8  ;;  %v583_v33 = vpop.permute.xlu0 %582  ;;  %v571_v28 = vrot.slane %v569_v19, 6  ;;  %v392_v37 = vrot.slane %v389_v20, 2  ;;  %v465_v38 = vadd.f32 %v453_v22, %v389_v20 }
 0x27b   :  { %v449_v34 = vmax.f32 %v445_v63, %v447_v23  ;;  %v388_v35 = vmax.f32 %v378_v15, %v386_v24  ;;  %v457_v16 = vrot.slane %v455_v26, 4  ;;  %v462_v42 = vrot.slane %v460_v32, 6 }
 0x27c   :  { %v558_v36 = vmax.f32 %v550_v30, %v556_v31  ;;  %v585_v39 = vpop.permute.xlu1 %584  ;;  %v395_v6 = vrot.slane %v389_v20, 4  ;;  %v468_v55 = vrot.slane %v465_v38, 2 }
 0x27d   :  { %v390_v25 = vmax.f32 %v388_v35, %v389_v20  ;;  %v459_v40 = vmax.f32 %v449_v34, %v457_v16  ;;  %v586_v43 = vsel %vm215_vm5, %v583_v33, %v585_v39 }
 0x27e   :  { %v573_v41 = vmax.f32 %v558_v36, %v571_v28  ;;  %v588_v45 = vadd.f32 %v586_v43, %v575_v27  ;;  %v596_v46 = vadd.f32 %v595_v1, %v586_v43  ;;  %v604_v51 = vpop.permute.xlu0 %603 }
 0x27f   :  { %v464_v47 = vmax.f32 %v459_v40, %v462_v42  ;;  %v394_v48 = vmax.f32 %v390_v25, %v392_v37 }
 0x280   :  { %v577_v49 = vmax.f32 %v573_v41, %v576_v44  ;;  %v590_v50 = vrot.slane %v588_v45, 2  ;;  %v606_v52 = vpop.permute.xlu1 %605  ;;  %v598_v59 = vrot.slane %v596_v46, 4 }
 0x281   :  { %v466_v53 = vmax.f32 %v464_v47, %v465_v38  ;;  %v607_v56 = vsel %vm215_vm5, %v604_v51, %v606_v52  ;;  %v397_v57 = vmax.f32 %v394_v48, %v395_v6 }
 0x282   :  { %v592_v58 = vmax.f32 %v577_v49, %v590_v50  ;;  %v609_v60 = vadd.f32 %v607_v56, %v924_v21  ;;  %v616_v62 = vadd.f32 %v607_v56, %v937_v29  ;;  %v681_v21 = vld [vmem:[%s987_s2] ss:$0 sm:$0xff] }
 0x283   :  { %v470_v0 = vmax.f32 %v466_v53, %v468_v55 }
 0x284   :  { %v610_v18 = vadd.f32 %v609_v60, %v593_v11  ;;  %v600_v2 = vmax.f32 %v592_v58, %v598_v59  ;;  %v617_v3 = vadd.f32 %v616_v62, %v593_v11 }
 0x285   :  { %621 = vrot.lane.b32.xlu0 %v470_v0, %s822_s10 }
 0x286   :  { %v611_v61 = vadd.f32 %v610_v18, %v586_v43  ;;  %v618_v54 = vadd.f32 %v617_v3, %v586_v43 }
 0x288   :  { %v613_v4 = vrot.slane %v611_v61, 6 }
 0x28a   :  { %v615_v5 = vmax.f32 %v600_v2, %v613_v4 }
 0x28c   :  { %v619_v7 = vmax.f32 %v615_v5, %v618_v54 }
 0x28e   :  { %625 = vrot.lane.b32.xlu1 %v619_v7, %s824_s12 }
 0x2f7   :  { %v622_v9 = vpop.permute.xlu0 %621 }
 0x2f8   :  { %v629_v29 = vsel %vm628_vm8, %v397_v57, %v622_v9 }
 0x300   :  { %v626_v10 = vpop.permute.xlu1 %625 }
 0x301   :  { %v630_v12 = vsel %vm215_vm5, %v629_v29, %v626_v10 }
 0x302   :  { %v638_v13 = vadd.f32 %v681_v21, %v630_v12 }
 0x304   :  { %733 = vtanh.f32 %v638_v13 }
 0x311   :  { %v734_v14 = vpop.eup %733 }
 0x312   :  { %640 = vst [vmem:[#allocation7] sm:$0x3] %v734_v14 }
 0x313   :  { %786 = shalt.err (!%p783_p0)
}
 0x314   :  { %650 = dma.vmem_to_hbm [thread:$0]  %s648_s16, 32, %s988_s3, [#allocation4]  }
 0x315   :  { %799 = dma.done.wait [#allocation4], 32  }
 0x316   :  { %800 = vsyncadd [#allocation4], 4294967264 }
 0x317   :  { %654 = vsyncpa [#allocation3], 1 }
 0x318   :  { %655 = vsyncpa [#allocation6], 1 }
 0x319   :  { %656 = vsyncpa [#allocation4], 1 }

</bundles_post_ra>
